<compile_context>
chip_gen: v6e
topology: v6e:2x2x1
jax: 0.10.0
libtpu: 0.0.40
codegen_flags: <defaults>
</compile_context>

<pallas_src>
import functools

import jax
import jax.numpy as jnp
from jax.experimental import pallas as pl
from jax.experimental.pallas import tpu as pltpu


def _round_up(x, m):
    return ((x + m - 1) // m) * m


def _ffn_kernel(x_ref, w1_ref, b1_ref, w2_ref, b2_ref, o_ref, acc_ref):
    # Grid = (row_tiles, hidden_chunks).  Axis 1 is the reduction axis.
    # x_ref : (tm, d_model)    row tile (constant over axis 1 -> stays resident)
    # w1_ref: (d_model, th)    hidden chunk of w1
    # b1_ref: (1, th)          hidden chunk of b1
    # w2_ref: (th, d_model)    hidden chunk of w2
    # b2_ref: (1, d_model)     resident
    # o_ref : (tm, d_model)    output tile (constant over axis 1)
    # acc_ref: (tm, d_model)   f32 accumulator scratch
    k = pl.program_id(1)

    @pl.when(k == 0)
    def _init():
        acc_ref[...] = jnp.zeros_like(acc_ref)

    # h_chunk = relu(x @ w1[:, chunk] + b1[chunk])   (tm, th) f32, bounded size
    h = jnp.dot(x_ref[...], w1_ref[...], preferred_element_type=jnp.float32)
    h = jnp.maximum(h + b1_ref[...].astype(jnp.float32), jnp.float32(0.0))

    # acc += h_chunk @ w2[chunk, :]
    acc_ref[...] += jnp.dot(h.astype(w2_ref.dtype), w2_ref[...],
                            preferred_element_type=jnp.float32)

    @pl.when(k == pl.num_programs(1) - 1)
    def _finalize():
        o_ref[...] = (acc_ref[...] + b2_ref[...].astype(jnp.float32)
                      ).astype(o_ref.dtype)


@functools.partial(jax.jit, static_argnames=("tile_rows", "hidden_tile"))
def feed_forward_forward(x, w1, b1, w2, b2, *, tile_rows=None, hidden_tile=512):
    """Equivalent of FeedForwardLayer.forward(x).

    x : (..., d_model)
    w1: (d_model, hidden)   (= PyTorch linear1.weight.T)
    b1: (hidden,)
    w2: (hidden, d_model)   (= PyTorch linear2.weight.T)
    b2: (d_model,)
    """
    orig_shape = x.shape
    d_model = orig_shape[-1]
    hidden = w1.shape[1]
    assert w1.shape == (d_model, hidden)
    assert b1.shape == (hidden,)
    assert w2.shape == (hidden, d_model)
    assert b2.shape == (d_model,)

    x2 = x.reshape(-1, d_model)
    rows = x2.shape[0]
    itemsize = jnp.dtype(x.dtype).itemsize
    w_itemsize = jnp.dtype(w1.dtype).itemsize
    # Sublane packing: 8 rows (f32) / 16 (bf16) / 32 (int8).
    row_mult = max(8, 32 // itemsize)

    # ---- Row tiling: minimize padding instead of rounding up to a fixed tm.
    if tile_rows is None:
        tile_rows = 512 if itemsize <= 2 else 256
    n_row = pl.cdiv(rows, tile_rows)
    tm = _round_up(pl.cdiv(rows, n_row), row_mult)
    rows_padded = tm * n_row
    if rows_padded != rows:
        x2 = jnp.pad(x2, ((0, rows_padded - rows), (0, 0)))

    # ---- Hidden-dimension chunking: bounds the live (tm, th) f32 intermediate
    # and streams w1/w2 through VMEM when they don't fit resident.
    if hidden <= hidden_tile:
        th = hidden                      # full dim -> no (8,128) constraint issue
        hidden_padded = hidden
    else:
        th = _round_up(hidden_tile, 128)            # lane-aligned chunk
        hidden_padded = _round_up(hidden, th)
    n_h = hidden_padded // th
    if hidden_padded != hidden:
        pad_h = hidden_padded - hidden
        # Zero-padded hidden units: relu(x@0 + 0) = 0 -> contribute nothing.
        w1 = jnp.pad(w1, ((0, 0), (0, pad_h)))
        b1 = jnp.pad(b1, ((0, pad_h),))
        w2 = jnp.pad(w2, ((0, pad_h), (0, 0)))

    # ---- Explicit VMEM budget -> vmem_limit_bytes (capped at 64 MiB: safe on
    # v7x's 64 MiB/TC; on v5e/v6e this could go up to ~100 MiB if ever needed).
    budget = (
        2 * tm * d_model * itemsize          # x tiles (double-buffered)
        + 2 * tm * d_model * itemsize        # out tiles
        + 2 * d_model * th * w_itemsize      # w1 chunk (double-buffered stream)
        + 2 * th * d_model * w_itemsize      # w2 chunk
        + 2 * (th + d_model) * w_itemsize    # biases
        + tm * d_model * 4                   # f32 accumulator scratch
        + tm * th * 4                        # live f32 hidden chunk
    )
    vmem_limit = int(max(32 * 1024 * 1024, min(64 * 1024 * 1024, 2 * budget)))

    # ---- Advisory cost estimate for XLA's scheduler.
    cost = pl.CostEstimate(
        flops=4 * rows * d_model * hidden,          # two matmuls
        transcendentals=0,
        bytes_accessed=(
            2 * rows * d_model * itemsize                     # read x + write y
            + 2 * hidden * d_model * w_itemsize               # w1 + w2
            + (hidden + d_model) * w_itemsize                 # biases
        ),
    )

    out = pl.pallas_call(
        _ffn_kernel,
        out_shape=jax.ShapeDtypeStruct((rows_padded, d_model), x.dtype),
        grid_spec=pltpu.PrefetchScalarGridSpec(
            num_scalar_prefetch=0,
            grid=(n_row, n_h),
            in_specs=[
                pl.BlockSpec((tm, d_model), lambda i, k: (i, 0)),   # x tile
                pl.BlockSpec((d_model, th), lambda i, k: (0, k)),   # w1 chunk
                pl.BlockSpec((1, th), lambda i, k: (0, k)),         # b1 chunk
                pl.BlockSpec((th, d_model), lambda i, k: (k, 0)),   # w2 chunk
                pl.BlockSpec((1, d_model), lambda i, k: (0, 0)),    # b2 resident
            ],
            out_specs=pl.BlockSpec((tm, d_model), lambda i, k: (i, 0)),
            scratch_shapes=[pltpu.VMEM((tm, d_model), jnp.float32)],
        ),
        compiler_params=pltpu.CompilerParams(
            dimension_semantics=("parallel", "arbitrary"),
            vmem_limit_bytes=vmem_limit,
        ),
        cost_estimate=cost,
    )(x2, w1, b1.reshape(1, hidden_padded), w2, b2.reshape(1, d_model))

    return out[:rows].reshape(orig_shape)


def _reference(x, w1, b1, w2, b2):
    h = jnp.maximum(x @ w1 + b1, 0.0)
    return h @ w2 + b2


if __name__ == "__main__":
    key = jax.random.PRNGKey(0)

    # --- Test 1: module-default sizes (d_model=64, hidden=32) ---------------
    batch, seq, d_model, hidden = 2, 8, 64, 32
    kx, kw1, kb1, kw2, kb2, k2 = jax.random.split(key, 6)
    x = jax.random.normal(kx, (batch, seq, d_model), dtype=jnp.float32)
    # Weights in (in, out) layout == transpose of PyTorch nn.Linear.weight.
    w1 = jax.random.normal(kw1, (d_model, hidden), dtype=jnp.float32) * 0.1
    b1 = jax.random.normal(kb1, (hidden,), dtype=jnp.float32) * 0.1
    w2 = jax.random.normal(kw2, (hidden, d_model), dtype=jnp.float32) * 0.1
    b2 = jax.random.normal(kb2, (d_model,), dtype=jnp.float32) * 0.1

    out = jax.block_until_ready(feed_forward_forward(x, w1, b1, w2, b2))
    ref = _reference(x, w1, b1, w2, b2)
    assert out.shape == x.shape, out.shape
    assert out.dtype == x.dtype
    assert jnp.allclose(out, ref, atol=1e-5, rtol=1e-5), "mismatch vs reference (test 1)"

    # --- Test 2: exercise hidden-chunking + row-padding paths ---------------
    rows2, d2, h2 = 300, 128, 800
    ks = jax.random.split(k2, 5)
    xb = jax.random.normal(ks[0], (rows2, d2), dtype=jnp.float32)
    w1b = jax.random.normal(ks[1], (d2, h2), dtype=jnp.float32) * 0.05
    b1b = jax.random.normal(ks[2], (h2,), dtype=jnp.float32) * 0.05
    w2b = jax.random.normal(ks[3], (h2, d2), dtype=jnp.float32) * 0.05
    b2b = jax.random.normal(ks[4], (d2,), dtype=jnp.float32) * 0.05

    out2 = jax.block_until_ready(
        feed_forward_forward(xb, w1b, b1b, w2b, b2b, tile_rows=128, hidden_tile=256))
    ref2 = _reference(xb, w1b, b1b, w2b, b2b)
    assert out2.shape == xb.shape
    assert jnp.allclose(out2, ref2, atol=1e-3, rtol=1e-3), "mismatch vs reference (test 2)"

    print("KERNEL_OK")
</pallas_src>

<mosaic_0001>
module attributes {stable_mosaic.version = 11 : i64} {
  func.func @_ffn_kernel(%arg0: i32, %arg1: i32, %arg2: memref<16x64xf32, #tpu.memory_space<vmem>>, %arg3: memref<64x32xf32, #tpu.memory_space<vmem>>, %arg4: memref<1x32xf32, #tpu.memory_space<vmem>>, %arg5: memref<32x64xf32, #tpu.memory_space<vmem>>, %arg6: memref<1x64xf32, #tpu.memory_space<vmem>>, %arg7: memref<16x64xf32, #tpu.memory_space<vmem>>, %arg8: memref<16x64xf32, #tpu.memory_space<vmem>>) attributes {dimension_semantics = [#tpu.dimension_semantics<parallel>, #tpu.dimension_semantics<arbitrary>], iteration_bounds = array<i64: 1, 1>, scalar_prefetch = 0 : i64, scratch_operands = 1 : i64, tpu.core_type = #tpu.core_type<tc>, window_params = [{transform_indices = @transform_0, window_bounds = array<i64: 16, 64>}, {transform_indices = @transform_1, window_bounds = array<i64: 64, 32>}, {transform_indices = @transform_2, window_bounds = array<i64: 1, 32>}, {transform_indices = @transform_3, window_bounds = array<i64: 32, 64>}, {pipeline_mode = #tpu.pipeline_mode<synchronous>, transform_indices = @transform_4, window_bounds = array<i64: 1, 64>}, {transform_indices = @transform_5, window_bounds = array<i64: 16, 64>}]} {
    %c0_i32 = arith.constant 0 : i32
    %0 = arith.cmpi eq, %arg1, %c0_i32 : i32
    %1 = arith.extui %0 : i1 to i32
    %c0_i32_0 = arith.constant 0 : i32
    %2 = arith.cmpi ne, %1, %c0_i32_0 : i32
    scf.if %2 {
      %cst_16 = arith.constant 0.000000e+00 : f32
      %19 = vector.broadcast %cst_16 : f32 to vector<16x64xf32>
      %c0_17 = arith.constant 0 : index
      %c0_18 = arith.constant 0 : index
      %20 = vector.load %arg8[%c0_17, %c0_18] : memref<16x64xf32, #tpu.memory_space<vmem>>, vector<16x64xf32>
      tpu.vector_store %arg8[%c0_17, %c0_18], %19 {strides = array<i32>} : memref<16x64xf32, #tpu.memory_space<vmem>>, vector<16x64xf32>,
    } else {
    }
    %c0 = arith.constant 0 : index
    %c0_1 = arith.constant 0 : index
    %3 = vector.load %arg2[%c0, %c0_1] : memref<16x64xf32, #tpu.memory_space<vmem>>, vector<16x64xf32>
    %c0_2 = arith.constant 0 : index
    %c0_3 = arith.constant 0 : index
    %4 = vector.load %arg3[%c0_2, %c0_3] : memref<64x32xf32, #tpu.memory_space<vmem>>, vector<64x32xf32>
    %cst = arith.constant dense<0.000000e+00> : vector<16x32xf32>
    %5 = tpu.matmul %3, %4, %cst {dimension_numbers = #tpu.dot_dimension_numbers<[1], [0], [0], [1], [0, 0, 1, 1], [], []>} : vector<16x64xf32>, vector<64x32xf32>, vector<16x32xf32> -> vector<16x32xf32>
    %c0_4 = arith.constant 0 : index
    %c0_5 = arith.constant 0 : index
    %6 = vector.load %arg4[%c0_4, %c0_5] : memref<1x32xf32, #tpu.memory_space<vmem>>, vector<1x32xf32>
    %7 = vector.broadcast %6 : vector<1x32xf32> to vector<16x32xf32>
    %8 = arith.addf %5, %7 : vector<16x32xf32>
    %cst_6 = arith.constant 0.000000e+00 : f32
    %9 = vector.broadcast %cst_6 : f32 to vector<16x32xf32>
    %10 = arith.maximumf %8, %9 : vector<16x32xf32>
    %c0_7 = arith.constant 0 : index
    %c0_8 = arith.constant 0 : index
    %11 = vector.load %arg8[%c0_7, %c0_8] : memref<16x64xf32, #tpu.memory_space<vmem>>, vector<16x64xf32>
    %c0_9 = arith.constant 0 : index
    %c0_10 = arith.constant 0 : index
    %12 = vector.load %arg5[%c0_9, %c0_10] : memref<32x64xf32, #tpu.memory_space<vmem>>, vector<32x64xf32>
    %cst_11 = arith.constant dense<0.000000e+00> : vector<16x64xf32>
    %13 = tpu.matmul %10, %12, %cst_11 {dimension_numbers = #tpu.dot_dimension_numbers<[1], [0], [0], [1], [0, 0, 1, 1], [], []>} : vector<16x32xf32>, vector<32x64xf32>, vector<16x64xf32> -> vector<16x64xf32>
    %14 = arith.addf %11, %13 : vector<16x64xf32>
    %c0_12 = arith.constant 0 : index
    %c0_13 = arith.constant 0 : index
    %15 = vector.load %arg8[%c0_12, %c0_13] : memref<16x64xf32, #tpu.memory_space<vmem>>, vector<16x64xf32>
    tpu.vector_store %arg8[%c0_12, %c0_13], %14 {strides = array<i32>} : memref<16x64xf32, #tpu.memory_space<vmem>>, vector<16x64xf32>,
    %c0_i32_14 = arith.constant 0 : i32
    %16 = arith.cmpi eq, %arg1, %c0_i32_14 : i32
    %17 = arith.extui %16 : i1 to i32
    %c0_i32_15 = arith.constant 0 : i32
    %18 = arith.cmpi ne, %17, %c0_i32_15 : i32
    scf.if %18 {
      %c0_16 = arith.constant 0 : index
      %c0_17 = arith.constant 0 : index
      %19 = vector.load %arg8[%c0_16, %c0_17] : memref<16x64xf32, #tpu.memory_space<vmem>>, vector<16x64xf32>
      %c0_18 = arith.constant 0 : index
      %c0_19 = arith.constant 0 : index
      %20 = vector.load %arg6[%c0_18, %c0_19] : memref<1x64xf32, #tpu.memory_space<vmem>>, vector<1x64xf32>
      %21 = vector.broadcast %20 : vector<1x64xf32> to vector<16x64xf32>
      %22 = arith.addf %19, %21 : vector<16x64xf32>
      %c0_20 = arith.constant 0 : index
      %c0_21 = arith.constant 0 : index
      %23 = vector.load %arg7[%c0_20, %c0_21] : memref<16x64xf32, #tpu.memory_space<vmem>>, vector<16x64xf32>
      tpu.vector_store %arg7[%c0_20, %c0_21], %22 {strides = array<i32>} : memref<16x64xf32, #tpu.memory_space<vmem>>, vector<16x64xf32>,
    } else {
    }
    return
  }
  func.func @transform_0(%arg0: i32, %arg1: i32) -> (i32, i32) {
    %c0_i32 = arith.constant 0 : i32
    %c0_i32_0 = arith.constant 0 : i32
    return %arg0, %c0_i32 : i32, i32
  }
  func.func @transform_1(%arg0: i32, %arg1: i32) -> (i32, i32) {
    %c0_i32 = arith.constant 0 : i32
    %c0_i32_0 = arith.constant 0 : i32
    return %c0_i32, %arg1 : i32, i32
  }
  func.func @transform_2(%arg0: i32, %arg1: i32) -> (i32, i32) {
    %c0_i32 = arith.constant 0 : i32
    %c0_i32_0 = arith.constant 0 : i32
    return %c0_i32, %arg1 : i32, i32
  }
  func.func @transform_3(%arg0: i32, %arg1: i32) -> (i32, i32) {
    %c0_i32 = arith.constant 0 : i32
    %c0_i32_0 = arith.constant 0 : i32
    return %arg1, %c0_i32 : i32, i32
  }
  func.func @transform_4(%arg0: i32, %arg1: i32) -> (i32, i32) {
    %c0_i32 = arith.constant 0 : i32
    %c0_i32_0 = arith.constant 0 : i32
    %c0_i32_1 = arith.constant 0 : i32
    return %c0_i32, %c0_i32_0 : i32, i32
  }
  func.func @transform_5(%arg0: i32, %arg1: i32) -> (i32, i32) {
    %c0_i32 = arith.constant 0 : i32
    %c0_i32_0 = arith.constant 0 : i32
    return %arg0, %c0_i32 : i32, i32
  }
}

</mosaic_0001>

<bundles_post_ra>
// kernel: feed_forward_forward.1
= control target key start
LH: loop header
LB: loop body
LE: loop exit
PB: predicated region body
PF: predicated region fallthrough
CT: control target
= control target key end

     0   :  { %vm25_vm0 = vcmask 523264   ;;  %s424_s0 = inlined_call_operand.vmem [shape: f32[16,64], index: 0, kind: input, shape index: {}]   ;;  %s425_s1 = inlined_call_operand.vmem [shape: f32[64,32], index: 1, kind: input, shape index: {}]   ;;  %s426_s2 = inlined_call_operand.vmem [shape: f32[1,32], index: 2, kind: input, shape index: {}]   ;;  %s427_s3 = inlined_call_operand.vmem [shape: f32[32,64], index: 3, kind: input, shape index: {}]   ;;  %s428_s4 = inlined_call_operand.vmem [shape: f32[1,64], index: 4, kind: input, shape index: {}]   ;;  %s429_s5 = inlined_call_operand.hbm [shape: f32[16,64], index: 5, kind: output, shape index: {}]  }
   0x1   :  { %v37_v0 = vld [vmem:[%s425_s1 + $0x38] sm:$0xff]  ;;  %v36_v1 = vld [vmem:[%s425_s1 + $0x30] sm:$0xff]  ;;  %v35_v2 = vld [vmem:[%s425_s1 + $0x28] sm:$0xff] }
   0x2   :  { %275 = vmatprep.subr.mxu0 %v37_v0  ;;  %v28_v3 = vld [vmem:[%s424_s0] sm:$0xff] }
   0x3   :  { %276 = vmatpush3.msra.mxu0 %v37_v0  ;;  %291 = vmatprep.mubr.msk.f32.mxu0 %vm25_vm0, %v28_v3 }
   0x4   :  { %277 = vmatprep.subr.mxu0 %v36_v1 }
   0x5   :  { %10 = vsyncpa [#allocation4], 0  ;;  %278 = vmatpush3.msra.mxu0 %v36_v1  ;;  %v34_v4 = vld [vmem:[%s425_s1 + $0x20] sm:$0xff]  ;;  %v33_v5 = vld [vmem:[%s425_s1 + $0x18] sm:$0xff]  ;;  %v331_v14 = vmov 0.0   ;;  %vm135_vm1 = vcmask 261120  }
   0x6   :  { %279 = vmatprep.subr.mxu0 %v35_v2  ;;  %v32_v6 = vld [vmem:[%s425_s1 + $0x10] sm:$0xff]  ;;  %v31_v7 = vld [vmem:[%s425_s1 + $0x8] sm:$0xff]  ;;  %v30_v8 = vld [vmem:[%s425_s1] sm:$0xff]  ;;  %27 = vst.msk [vmem:[#allocation2 + $0x8] sm:$0xff] %vm25_vm0, %v331_v14  ;;  %s332_s21 = smov [#allocation3]  }
   0x7   :  { %280 = vmatpush3.msra.mxu0 %v35_v2  ;;  %v29_v9 = vld [vmem:[%s424_s0 + $0x8] sm:$0xff]  ;;  %v134_v10 = vld [vmem:[%s427_s3 + $0x18] sm:$0xff]  ;;  %v133_v11 = vld [vmem:[%s427_s3 + $0x10] sm:$0xff]  ;;  %26 = vst.msk [vmem:[#allocation2] sm:$0xff] %vm25_vm0, %v331_v14  ;;  %s242_s22 = sshll.u32 %s332_s21, 4  ;;  %s243_s22 = int_to_ptr.vmem [resolvable:$true] %s242_s22 }
   0x8   :  { %281 = vmatprep.subr.mxu0 %v34_v4  ;;  %294 = vmatprep.subr.mxu1 %v134_v10  ;;  %v132_v12 = vld [vmem:[%s427_s3 + $0x8] sm:$0xff]  ;;  %v131_v13 = vld [vmem:[%s427_s3] sm:$0xff]  ;;  %s309_s23 = scalar_lea.vmem %s243_s22, 256  ;;  %p314_p1 = scmp.lt.s32.totalorder %s243_s22, %s243_s22 }
   0x9   :  { %282 = vmatpush3.msra.mxu0 %v34_v4  ;;  %295 = vmatpush3.msra.mxu1 %v134_v10  ;;  %v253_v15 = vld [vmem:[%s426_s2] ss:$0 sm:$0xff]  ;;  %p310_p0 = scmp.ne.s32.totalorder %s243_s22, %s309_s23  ;;  %p315_p2 = scmp.lt.s32.totalorder %s309_s23, %s309_s23 }
   0xa   :  { %283 = vmatprep.subr.mxu0 %v33_v5  ;;  %296 = vmatprep.subr.mxu1 %v133_v11  ;;  %v258_v28 = vld [vmem:[%s428_s4] ss:$0 sm:$0xff] }
   0xb   :  { %284 = vmatpush3.msra.mxu0 %v33_v5  ;;  %297 = vmatpush3.msra.mxu1 %v133_v11  ;;  %p316_p3 = por %p315_p2, %p314_p1 }
   0xc   :  { %285 = vmatprep.subr.mxu0 %v32_v6  ;;  %298 = vmatprep.subr.mxu1 %v132_v12 }
   0xd   :  { %286 = vmatpush3.msra.mxu0 %v32_v6  ;;  %299 = vmatpush3.msra.mxu1 %v132_v12  ;;  %v130_v22 = vld [vmem:[#allocation2 + $0x8] sm:$0xff]  ;;  %p317_p4 = pnand %p316_p3, %p310_p0 }
   0xe   :  { %287 = vmatprep.subr.mxu0 %v31_v7  ;;  %300 = vmatprep.subr.mxu1 %v131_v13  ;;  %v129_v24 = vld [vmem:[#allocation2] sm:$0xff] }
   0xf   :  { %288 = vmatpush3.msra.mxu0 %v31_v7  ;;  %301 = vmatpush3.msra.mxu1 %v131_v13 }
  0x10   :  { %289 = vmatprep.subr.mxu0 %v30_v8 }
  0x11   :  { %290 = vmatpush3.msra.mxu0 %v30_v8 }
  0x12   :  { %292 = vmatmul.mubr.msk.f32.vlgmr.msra.gmra.mxu0 %vm25_vm0, %v29_v9 }
  0xd2   :  { %v293_v16 = vpop.f32.mrf.mxu0 }
  0xd3   :  { %v124_v17 = vadd.f32 %v293_v16, %v253_v15 }
  0xd4   :  { %v118_v18 = vpop.f32.mrf.mxu0 }
  0xd5   :  { %v119_v19 = vadd.f32 %v253_v15, %v118_v18  ;;  %v128_v21 = vmax.f32 %v124_v17, 0.0 }
  0xd7   :  { %v127_v20 = vmax.f32 %v119_v19, 0.0 }
  0xd9   :  { %302 = vmatprep.mubr.msk.f32.mxu1 %vm135_vm1, %v127_v20 }
  0xda   :  { %303 = vmatmul.mubr.msk.f32.vlgmr.msra.gmra.mxu1 %vm135_vm1, %v128_v21 }
 0x19a   :  { %v304_v23 = vpop.f32.mrf.mxu1 }
 0x19b   :  { %v218_v25 = vadd.f32 %v304_v23, %v130_v22 }
 0x19c   :  { %v208_v26 = vpop.f32.mrf.mxu1 }
 0x19d   :  { %220 = vst.msk [vmem:[#allocation2 + $0x8] sm:$0xff] %vm25_vm0, %v218_v25  ;;  %v217_v27 = vadd.f32 %v208_v26, %v129_v24 }
 0x19f   :  { %219 = vst.msk [vmem:[#allocation2] sm:$0xff] %vm25_vm0, %v217_v27 }
 0x1a4   :  { %v225_v29 = vld [vmem:[#allocation2 + $0x8] sm:$0xff] }
 0x1a5   :  { %v234_v30 = vadd.f32 %v258_v28, %v225_v29 }
 0x1a6   :  { %v224_v31 = vld [vmem:[#allocation2] sm:$0xff] }
 0x1a7   :  { %v233_v32 = vadd.f32 %v258_v28, %v224_v31  ;;  %236 = vst.msk [vmem:[#allocation3 + $0x8] sm:$0xff] %vm25_vm0, %v234_v30 }
 0x1a9   :  { %235 = vst.msk [vmem:[#allocation3] sm:$0xff] %vm25_vm0, %v233_v32 }
 0x1aa   :  { %320 = shalt.err (!%p317_p4)
}
 0x1ab   :  { %s333_s24 = smov 128   ;;  %s334_s4 = smov 8  }
 0x1ac   :  { %248 = dma.vmem_to_hbm [thread:$0]  %s243_s22, 256, %s429_s5, [#allocation4], %s333_s24, %s333_s24, %s334_s4  }
 0x1ad   :  { %329 = dma.done.wait [#allocation4], 256  }
 0x1ae   :  { %330 = vsyncadd [#allocation4], 4294967040 }
 0x1af   :  { %252 = vsyncpa [#allocation4], 1 }

</bundles_post_ra>
